<compile_context>
chip_gen: v7x
topology: tpu7x:2x2x1
jax: 0.10.0
libtpu: 0.0.40
codegen_flags: <defaults>
</compile_context>

<pallas_src>
import jax
import jax.numpy as jnp
from jax import lax
from jax.experimental import pallas as pl
from jax.experimental.pallas import tpu as pltpu


def _decoder_kernel(h0_ref, w_ref, b_ref, out_ref):
    """Autoregressive multi-layer GRU decode, fully inside one kernel.

    h0_ref : (L, B, H)     initial hidden state per layer
    w_ref  : (L, 2H, 4H)   packed per-layer weights (already (in, out) layout):
                             rows 0:H  -> [W_ir | W_iz | W_in | 0   ]
                             rows H:2H -> [W_hr | W_hz | 0    | W_hn]
    b_ref  : (L, 1, 4H)    packed biases [b_ir+b_hr, b_iz+b_hz, b_in, b_hn]
    out_ref: (T, B, H)     per-step top-layer outputs
    """
    L, B, H = h0_ref.shape
    T = out_ref.shape[0]
    w_dtype = w_ref.dtype
    out_dtype = out_ref.dtype

    # Hoisted loop-invariant bias broadcasts (done once, outside the time loop).
    biases = [jnp.broadcast_to(b_ref[l], (B, 4 * H)) for l in range(L)]

    def gate_math(g, h):
        # g: (B, 4H) pre-activations [r | z | i_n | h_n];  h: (B, H) prev hidden.
        rz = jax.nn.sigmoid(g[:, 0:2 * H])          # one EUP pass for r and z
        r = rz[:, 0:H]
        z = rz[:, H:2 * H]
        zh = z * h                                   # off the tanh critical path
        one_minus_z = 1.0 - z
        n = jnp.tanh(g[:, 2 * H:3 * H] + r * g[:, 3 * H:4 * H])
        return one_minus_z * n + zh

    if L == 1:
        # --- Single-layer fast path (module default) -------------------------
        w_full = w_ref[0]                            # (2H, 4H), loaded once
        w_hid = w_full[H:, :]                        # (H, 4H): step 0, x == 0
        w_fold = w_full[:H, :] + w_hid               # (H, 4H): t >= 1, x == h
        bias = biases[0]

        def step(h, w):
            g = jnp.dot(h.astype(w_dtype), w,
                        preferred_element_type=jnp.float32) + bias
            return gate_math(g, h)

        h = step(h0_ref[0], w_hid)                   # peeled t == 0 (zero input)
        out_ref[0] = h.astype(out_dtype)

        if T <= 32:
            for t in range(1, T):                    # trace-time constant: unroll
                h = step(h, w_fold)
                out_ref[t] = h.astype(out_dtype)
        else:
            def body(t, h):
                h_new = step(h, w_fold)
                out_ref[t] = h_new.astype(out_dtype)
                return h_new
            lax.fori_loop(1, T, body, h)
        return

    # --- Generic multi-layer path --------------------------------------------
    weights = [w_ref[l] for l in range(L)]           # hoisted weight loads

    def cell(l, x, h):
        if x is None:                                # t == 0: zero decoder input
            g = jnp.dot(h.astype(w_dtype), weights[l][H:, :],
                        preferred_element_type=jnp.float32)
        else:
            xh = jnp.concatenate([x, h], axis=-1).astype(w_dtype)   # (B, 2H)
            g = jnp.dot(xh, weights[l], preferred_element_type=jnp.float32)
        return gate_math(g + biases[l], h)

    def stack_step(x, hs):
        inp = x
        new_hs = []
        for l in range(L):                           # static layer loop
            h_new = cell(l, inp, hs[l])
            new_hs.append(h_new)
            inp = h_new                              # input to the next layer
        return inp, tuple(new_hs)

    x0, hs0 = stack_step(None, tuple(h0_ref[l] for l in range(L)))
    out_ref[0] = x0.astype(out_dtype)

    if T <= 32:
        x, hs = x0, hs0
        for t in range(1, T):
            x, hs = stack_step(x, hs)
            out_ref[t] = x.astype(out_dtype)
    else:
        def body(t, carry):
            x, hs = carry
            x_new, hs_new = stack_step(x, hs)
            out_ref[t] = x_new.astype(out_dtype)
            return (x_new, hs_new)
        lax.fori_loop(1, T, body, (x0, hs0))


def init_gru_params(key, hidden_size, n_layers):
    """PyTorch-style GRU init: U(-1/sqrt(H), 1/sqrt(H)); gate order (r, z, n).

    Weights are stored pre-transposed per gate: [layer, gate] -> (H_in, H_out).
    """
    H = hidden_size
    k = 1.0 / jnp.sqrt(jnp.float32(H))
    keys = jax.random.split(key, 4)
    w_ih = jax.random.uniform(keys[0], (n_layers, 3, H, H), jnp.float32, -k, k)
    w_hh = jax.random.uniform(keys[1], (n_layers, 3, H, H), jnp.float32, -k, k)
    b_ih = jax.random.uniform(keys[2], (n_layers, 3, 1, H), jnp.float32, -k, k)
    b_hh = jax.random.uniform(keys[3], (n_layers, 3, 1, H), jnp.float32, -k, k)
    return w_ih, w_hh, b_ih, b_hh


def pack_gru_params(params, weights_dtype=jnp.float32):
    """Pack per-gate GRU params into one (L, 2H, 4H) weight and (L, 1, 4H) bias.

    weights_dtype=jnp.bfloat16 halves weight VMEM (relevant on v7x); gate math
    and accumulation stay in f32 inside the kernel.
    """
    w_ih, w_hh, b_ih, b_hh = params
    L, _, H, _ = w_ih.shape
    zeros = jnp.zeros((L, H, H), w_ih.dtype)
    top = jnp.concatenate([w_ih[:, 0], w_ih[:, 1], w_ih[:, 2], zeros], axis=-1)
    bot = jnp.concatenate([w_hh[:, 0], w_hh[:, 1], zeros, w_hh[:, 2]], axis=-1)
    w_cat = jnp.concatenate([top, bot], axis=1).astype(weights_dtype)   # (L, 2H, 4H)
    b_pack = jnp.concatenate(
        [b_ih[:, 0] + b_hh[:, 0],        # r: summed
         b_ih[:, 1] + b_hh[:, 1],        # z: summed
         b_ih[:, 2],                     # i_n bias
         b_hh[:, 2]],                    # h_n bias (scaled by r -> kept separate)
        axis=-1).astype(jnp.float32)     # (L, 1, 4H)
    return w_cat, b_pack


def decoder_forward(encoder_outputs, out_len, params, *, weights_dtype=jnp.float32):
    """Pallas equivalent of Decoder.forward.

    encoder_outputs: (L, B, T_enc, H) float32
    returns: (out_len * B, 1, H)  == torch.cat of out_len tensors of (B, 1, H).
    """
    w_cat, b_pack = pack_gru_params(params, weights_dtype)
    h0 = encoder_outputs[:, :, -1].astype(jnp.float32)      # (L, B, H)
    L, B, H = h0.shape

    # Single-buffered resident VMEM footprint (+ headroom), capped at 64 MiB (v7x).
    resident = (w_cat.size * w_cat.dtype.itemsize
                + 4 * (b_pack.size + h0.size + out_len * B * H))
    vmem_limit = int(min(max(2 * resident + (4 << 20), 32 << 20), 64 << 20))

    # No grid: single kernel invocation, whole arrays resident in VMEM with no
    # pipeline double-buffering of the loop-invariant weights.
    # TODO(synk): for large production B, add a parallel batch grid axis
    # (grid=(B//TB,), dimension_semantics=("parallel",)) to engage the 2nd TC on v7x.
    out = pl.pallas_call(
        _decoder_kernel,
        out_shape=jax.ShapeDtypeStruct((out_len, B, H), jnp.float32),
        compiler_params=pltpu.CompilerParams(vmem_limit_bytes=vmem_limit),
    )(h0, w_cat, b_pack)

    # torch.cat(output) with output[i] of shape (B, 1, H) -> (out_len*B, 1, H)
    return out.reshape(out_len * B, 1, H)


def decoder_forward_ref(encoder_outputs, out_len, params):
    """Pure-JAX reference for correctness checking (per-gate math)."""
    w_ih, w_hh, b_ih, b_hh = params
    h = encoder_outputs[:, :, -1]         # (L, B, H)
    L, B, H = h.shape
    x = jnp.zeros((B, H), jnp.float32)
    outs = []
    for _ in range(out_len):
        new_h = []
        inp = x
        for l in range(L):
            hl = h[l]
            gi = [inp @ w_ih[l, g] + b_ih[l, g] for g in range(3)]
            gh = [hl @ w_hh[l, g] + b_hh[l, g] for g in range(3)]
            r = jax.nn.sigmoid(gi[0] + gh[0])
            z = jax.nn.sigmoid(gi[1] + gh[1])
            n = jnp.tanh(gi[2] + r * gh[2])
            hl_new = (1.0 - z) * n + z * hl
            new_h.append(hl_new)
            inp = hl_new
        h = jnp.stack(new_h, axis=0)
        x = inp
        outs.append(inp[:, None, :])      # (B, 1, H)
    return jnp.concatenate(outs, axis=0)  # (out_len*B, 1, H)


if __name__ == "__main__":
    # Small deterministic example: output_size (hidden) = 32, batch = 4,
    # encoder time steps = 16, n_dec_layers = 1, out_len = 8.
    H, B, T_ENC = 32, 4, 16

    key = jax.random.PRNGKey(0)
    k_enc1, k_par1, k_enc2, k_par2 = jax.random.split(key, 4)

    # --- default single-layer decoder (exercises the folded fast path) -------
    L1, OUT_LEN1 = 1, 8
    enc1 = jax.random.normal(k_enc1, (L1, B, T_ENC, H), jnp.float32)
    params1 = init_gru_params(k_par1, H, L1)
    y1 = jax.block_until_ready(decoder_forward(enc1, OUT_LEN1, params1))
    y1_ref = decoder_forward_ref(enc1, OUT_LEN1, params1)
    assert y1.shape == (OUT_LEN1 * B, 1, H), y1.shape
    err1 = float(jnp.max(jnp.abs(y1 - y1_ref)))
    assert jnp.allclose(y1, y1_ref, atol=1e-4, rtol=1e-4), err1

    # --- 2-layer decoder (exercises the generic stacked path) ----------------
    L2, OUT_LEN2 = 2, 4
    enc2 = jax.random.normal(k_enc2, (L2, B, T_ENC, H), jnp.float32)
    params2 = init_gru_params(k_par2, H, L2)
    y2 = jax.block_until_ready(decoder_forward(enc2, OUT_LEN2, params2))
    y2_ref = decoder_forward_ref(enc2, OUT_LEN2, params2)
    assert y2.shape == (OUT_LEN2 * B, 1, H), y2.shape
    err2 = float(jnp.max(jnp.abs(y2 - y2_ref)))
    assert jnp.allclose(y2, y2_ref, atol=1e-4, rtol=1e-4), err2

    # TODO(synk): nn.GRU inter-layer dropout (drop_ratio) is not implemented —
    # it is 0.0 by default and inactive in this forward; .detach() is a no-op in fwd.
    print("KERNEL_OK")
</pallas_src>

<mosaic_0001>
module attributes {stable_mosaic.version = 11 : i64} {
  func.func @_decoder_kernel(%arg0: memref<1x4x32xf32, #tpu.memory_space<vmem>>, %arg1: memref<1x64x128xf32, #tpu.memory_space<vmem>>, %arg2: memref<1x1x128xf32, #tpu.memory_space<vmem>>, %arg3: memref<8x4x32xf32, #tpu.memory_space<vmem>>) attributes {dimension_semantics = [], scalar_prefetch = 0 : i64, scratch_operands = 0 : i64, tpu.core_type = #tpu.core_type<tc>} {
    %c0 = arith.constant 0 : index
    %c0_0 = arith.constant 0 : index
    %c0_1 = arith.constant 0 : index
    %0 = vector.load %arg2[%c0, %c0_0, %c0_1] : memref<1x1x128xf32, #tpu.memory_space<vmem>>, vector<1x1x128xf32>
    %1 = vector.shape_cast %0 : vector<1x1x128xf32> to vector<1x128xf32>
    %2 = vector.shape_cast %1 : vector<1x128xf32> to vector<1x128xf32>
    %3 = vector.broadcast %2 : vector<1x128xf32> to vector<4x128xf32>
    %c0_2 = arith.constant 0 : index
    %c0_3 = arith.constant 0 : index
    %c0_4 = arith.constant 0 : index
    %4 = vector.load %arg1[%c0_2, %c0_3, %c0_4] : memref<1x64x128xf32, #tpu.memory_space<vmem>>, vector<1x64x128xf32>
    %5 = vector.shape_cast %4 : vector<1x64x128xf32> to vector<64x128xf32>
    %6 = vector.extract_strided_slice %5 {offsets = [32, 0], sizes = [32, 128], strides = [1, 1]} : vector<64x128xf32> to vector<32x128xf32>
    %7 = vector.extract_strided_slice %5 {offsets = [0, 0], sizes = [32, 128], strides = [1, 1]} : vector<64x128xf32> to vector<32x128xf32>
    %8 = arith.addf %7, %6 : vector<32x128xf32>
    %c0_5 = arith.constant 0 : index
    %c0_6 = arith.constant 0 : index
    %c0_7 = arith.constant 0 : index
    %9 = vector.load %arg0[%c0_5, %c0_6, %c0_7] : memref<1x4x32xf32, #tpu.memory_space<vmem>>, vector<1x4x32xf32>
    %10 = vector.shape_cast %9 : vector<1x4x32xf32> to vector<4x32xf32>
    %cst = arith.constant dense<0.000000e+00> : vector<4x128xf32>
    %11 = tpu.matmul %10, %6, %cst {dimension_numbers = #tpu.dot_dimension_numbers<[1], [0], [0], [1], [0, 0, 1, 1], [], []>} : vector<4x32xf32>, vector<32x128xf32>, vector<4x128xf32> -> vector<4x128xf32>
    %12 = arith.addf %11, %3 : vector<4x128xf32>
    %13 = vector.extract_strided_slice %12 {offsets = [0, 0], sizes = [4, 64], strides = [1, 1]} : vector<4x128xf32> to vector<4x64xf32>
    %14 = arith.negf %13 : vector<4x64xf32>
    %15 = math.exp %14 : vector<4x64xf32>
    %cst_8 = arith.constant 1.000000e+00 : f32
    %16 = vector.broadcast %cst_8 : f32 to vector<4x64xf32>
    %17 = arith.addf %16, %15 : vector<4x64xf32>
    %18 = arith.divf %16, %17 : vector<4x64xf32>
    %19 = vector.extract_strided_slice %18 {offsets = [0, 0], sizes = [4, 32], strides = [1, 1]} : vector<4x64xf32> to vector<4x32xf32>
    %20 = vector.extract_strided_slice %18 {offsets = [0, 32], sizes = [4, 32], strides = [1, 1]} : vector<4x64xf32> to vector<4x32xf32>
    %21 = arith.mulf %20, %10 : vector<4x32xf32>
    %cst_9 = arith.constant 1.000000e+00 : f32
    %22 = vector.broadcast %cst_9 : f32 to vector<4x32xf32>
    %23 = arith.subf %22, %20 : vector<4x32xf32>
    %24 = vector.extract_strided_slice %12 {offsets = [0, 64], sizes = [4, 32], strides = [1, 1]} : vector<4x128xf32> to vector<4x32xf32>
    %25 = vector.extract_strided_slice %12 {offsets = [0, 96], sizes = [4, 32], strides = [1, 1]} : vector<4x128xf32> to vector<4x32xf32>
    %26 = arith.mulf %19, %25 : vector<4x32xf32>
    %27 = arith.addf %24, %26 : vector<4x32xf32>
    %28 = math.tanh %27 : vector<4x32xf32>
    %29 = arith.mulf %23, %28 : vector<4x32xf32>
    %30 = arith.addf %29, %21 : vector<4x32xf32>
    %c0_10 = arith.constant 0 : index
    %c0_11 = arith.constant 0 : index
    %c0_12 = arith.constant 0 : index
    %31 = vector.load %arg3[%c0_10, %c0_11, %c0_12] : memref<8x4x32xf32, #tpu.memory_space<vmem>>, vector<1x4x32xf32>
    %32 = vector.shape_cast %31 : vector<1x4x32xf32> to vector<4x32xf32>
    %33 = vector.shape_cast %30 : vector<4x32xf32> to vector<1x4x32xf32>
    tpu.vector_store %arg3[%c0_10, %c0_11, %c0_12], %33 {strides = array<i32>} : memref<8x4x32xf32, #tpu.memory_space<vmem>>, vector<1x4x32xf32>,
    %cst_13 = arith.constant dense<0.000000e+00> : vector<4x128xf32>
    %34 = tpu.matmul %30, %8, %cst_13 {dimension_numbers = #tpu.dot_dimension_numbers<[1], [0], [0], [1], [0, 0, 1, 1], [], []>} : vector<4x32xf32>, vector<32x128xf32>, vector<4x128xf32> -> vector<4x128xf32>
    %35 = arith.addf %34, %3 : vector<4x128xf32>
    %36 = vector.extract_strided_slice %35 {offsets = [0, 0], sizes = [4, 64], strides = [1, 1]} : vector<4x128xf32> to vector<4x64xf32>
    %37 = arith.negf %36 : vector<4x64xf32>
    %38 = math.exp %37 : vector<4x64xf32>
    %cst_14 = arith.constant 1.000000e+00 : f32
    %39 = vector.broadcast %cst_14 : f32 to vector<4x64xf32>
    %40 = arith.addf %39, %38 : vector<4x64xf32>
    %41 = arith.divf %39, %40 : vector<4x64xf32>
    %42 = vector.extract_strided_slice %41 {offsets = [0, 0], sizes = [4, 32], strides = [1, 1]} : vector<4x64xf32> to vector<4x32xf32>
    %43 = vector.extract_strided_slice %41 {offsets = [0, 32], sizes = [4, 32], strides = [1, 1]} : vector<4x64xf32> to vector<4x32xf32>
    %44 = arith.mulf %43, %30 : vector<4x32xf32>
    %cst_15 = arith.constant 1.000000e+00 : f32
    %45 = vector.broadcast %cst_15 : f32 to vector<4x32xf32>
    %46 = arith.subf %45, %43 : vector<4x32xf32>
    %47 = vector.extract_strided_slice %35 {offsets = [0, 64], sizes = [4, 32], strides = [1, 1]} : vector<4x128xf32> to vector<4x32xf32>
    %48 = vector.extract_strided_slice %35 {offsets = [0, 96], sizes = [4, 32], strides = [1, 1]} : vector<4x128xf32> to vector<4x32xf32>
    %49 = arith.mulf %42, %48 : vector<4x32xf32>
    %50 = arith.addf %47, %49 : vector<4x32xf32>
    %51 = math.tanh %50 : vector<4x32xf32>
    %52 = arith.mulf %46, %51 : vector<4x32xf32>
    %53 = arith.addf %52, %44 : vector<4x32xf32>
    %c1 = arith.constant 1 : index
    %c0_16 = arith.constant 0 : index
    %c0_17 = arith.constant 0 : index
    %54 = vector.load %arg3[%c1, %c0_16, %c0_17] : memref<8x4x32xf32, #tpu.memory_space<vmem>>, vector<1x4x32xf32>
    %55 = vector.shape_cast %54 : vector<1x4x32xf32> to vector<4x32xf32>
    %56 = vector.shape_cast %53 : vector<4x32xf32> to vector<1x4x32xf32>
    tpu.vector_store %arg3[%c1, %c0_16, %c0_17], %56 {strides = array<i32>} : memref<8x4x32xf32, #tpu.memory_space<vmem>>, vector<1x4x32xf32>,
    %cst_18 = arith.constant dense<0.000000e+00> : vector<4x128xf32>
    %57 = tpu.matmul %53, %8, %cst_18 {dimension_numbers = #tpu.dot_dimension_numbers<[1], [0], [0], [1], [0, 0, 1, 1], [], []>} : vector<4x32xf32>, vector<32x128xf32>, vector<4x128xf32> -> vector<4x128xf32>
    %58 = arith.addf %57, %3 : vector<4x128xf32>
    %59 = vector.extract_strided_slice %58 {offsets = [0, 0], sizes = [4, 64], strides = [1, 1]} : vector<4x128xf32> to vector<4x64xf32>
    %60 = arith.negf %59 : vector<4x64xf32>
    %61 = math.exp %60 : vector<4x64xf32>
    %cst_19 = arith.constant 1.000000e+00 : f32
    %62 = vector.broadcast %cst_19 : f32 to vector<4x64xf32>
    %63 = arith.addf %62, %61 : vector<4x64xf32>
    %64 = arith.divf %62, %63 : vector<4x64xf32>
    %65 = vector.extract_strided_slice %64 {offsets = [0, 0], sizes = [4, 32], strides = [1, 1]} : vector<4x64xf32> to vector<4x32xf32>
    %66 = vector.extract_strided_slice %64 {offsets = [0, 32], sizes = [4, 32], strides = [1, 1]} : vector<4x64xf32> to vector<4x32xf32>
    %67 = arith.mulf %66, %53 : vector<4x32xf32>
    %cst_20 = arith.constant 1.000000e+00 : f32
    %68 = vector.broadcast %cst_20 : f32 to vector<4x32xf32>
    %69 = arith.subf %68, %66 : vector<4x32xf32>
    %70 = vector.extract_strided_slice %58 {offsets = [0, 64], sizes = [4, 32], strides = [1, 1]} : vector<4x128xf32> to vector<4x32xf32>
    %71 = vector.extract_strided_slice %58 {offsets = [0, 96], sizes = [4, 32], strides = [1, 1]} : vector<4x128xf32> to vector<4x32xf32>
    %72 = arith.mulf %65, %71 : vector<4x32xf32>
    %73 = arith.addf %70, %72 : vector<4x32xf32>
    %74 = math.tanh %73 : vector<4x32xf32>
    %75 = arith.mulf %69, %74 : vector<4x32xf32>
    %76 = arith.addf %75, %67 : vector<4x32xf32>
    %c2 = arith.constant 2 : index
    %c0_21 = arith.constant 0 : index
    %c0_22 = arith.constant 0 : index
    %77 = vector.load %arg3[%c2, %c0_21, %c0_22] : memref<8x4x32xf32, #tpu.memory_space<vmem>>, vector<1x4x32xf32>
    %78 = vector.shape_cast %77 : vector<1x4x32xf32> to vector<4x32xf32>
    %79 = vector.shape_cast %76 : vector<4x32xf32> to vector<1x4x32xf32>
    tpu.vector_store %arg3[%c2, %c0_21, %c0_22], %79 {strides = array<i32>} : memref<8x4x32xf32, #tpu.memory_space<vmem>>, vector<1x4x32xf32>,
    %cst_23 = arith.constant dense<0.000000e+00> : vector<4x128xf32>
    %80 = tpu.matmul %76, %8, %cst_23 {dimension_numbers = #tpu.dot_dimension_numbers<[1], [0], [0], [1], [0, 0, 1, 1], [], []>} : vector<4x32xf32>, vector<32x128xf32>, vector<4x128xf32> -> vector<4x128xf32>
    %81 = arith.addf %80, %3 : vector<4x128xf32>
    %82 = vector.extract_strided_slice %81 {offsets = [0, 0], sizes = [4, 64], strides = [1, 1]} : vector<4x128xf32> to vector<4x64xf32>
    %83 = arith.negf %82 : vector<4x64xf32>
    %84 = math.exp %83 : vector<4x64xf32>
    %cst_24 = arith.constant 1.000000e+00 : f32
    %85 = vector.broadcast %cst_24 : f32 to vector<4x64xf32>
    %86 = arith.addf %85, %84 : vector<4x64xf32>
    %87 = arith.divf %85, %86 : vector<4x64xf32>
    %88 = vector.extract_strided_slice %87 {offsets = [0, 0], sizes = [4, 32], strides = [1, 1]} : vector<4x64xf32> to vector<4x32xf32>
    %89 = vector.extract_strided_slice %87 {offsets = [0, 32], sizes = [4, 32], strides = [1, 1]} : vector<4x64xf32> to vector<4x32xf32>
    %90 = arith.mulf %89, %76 : vector<4x32xf32>
    %cst_25 = arith.constant 1.000000e+00 : f32
    %91 = vector.broadcast %cst_25 : f32 to vector<4x32xf32>
    %92 = arith.subf %91, %89 : vector<4x32xf32>
    %93 = vector.extract_strided_slice %81 {offsets = [0, 64], sizes = [4, 32], strides = [1, 1]} : vector<4x128xf32> to vector<4x32xf32>
    %94 = vector.extract_strided_slice %81 {offsets = [0, 96], sizes = [4, 32], strides = [1, 1]} : vector<4x128xf32> to vector<4x32xf32>
    %95 = arith.mulf %88, %94 : vector<4x32xf32>
    %96 = arith.addf %93, %95 : vector<4x32xf32>
    %97 = math.tanh %96 : vector<4x32xf32>
    %98 = arith.mulf %92, %97 : vector<4x32xf32>
    %99 = arith.addf %98, %90 : vector<4x32xf32>
    %c3 = arith.constant 3 : index
    %c0_26 = arith.constant 0 : index
    %c0_27 = arith.constant 0 : index
    %100 = vector.load %arg3[%c3, %c0_26, %c0_27] : memref<8x4x32xf32, #tpu.memory_space<vmem>>, vector<1x4x32xf32>
    %101 = vector.shape_cast %100 : vector<1x4x32xf32> to vector<4x32xf32>
    %102 = vector.shape_cast %99 : vector<4x32xf32> to vector<1x4x32xf32>
    tpu.vector_store %arg3[%c3, %c0_26, %c0_27], %102 {strides = array<i32>} : memref<8x4x32xf32, #tpu.memory_space<vmem>>, vector<1x4x32xf32>,
    %cst_28 = arith.constant dense<0.000000e+00> : vector<4x128xf32>
    %103 = tpu.matmul %99, %8, %cst_28 {dimension_numbers = #tpu.dot_dimension_numbers<[1], [0], [0], [1], [0, 0, 1, 1], [], []>} : vector<4x32xf32>, vector<32x128xf32>, vector<4x128xf32> -> vector<4x128xf32>
    %104 = arith.addf %103, %3 : vector<4x128xf32>
    %105 = vector.extract_strided_slice %104 {offsets = [0, 0], sizes = [4, 64], strides = [1, 1]} : vector<4x128xf32> to vector<4x64xf32>
    %106 = arith.negf %105 : vector<4x64xf32>
    %107 = math.exp %106 : vector<4x64xf32>
    %cst_29 = arith.constant 1.000000e+00 : f32
    %108 = vector.broadcast %cst_29 : f32 to vector<4x64xf32>
    %109 = arith.addf %108, %107 : vector<4x64xf32>
    %110 = arith.divf %108, %109 : vector<4x64xf32>
    %111 = vector.extract_strided_slice %110 {offsets = [0, 0], sizes = [4, 32], strides = [1, 1]} : vector<4x64xf32> to vector<4x32xf32>
    %112 = vector.extract_strided_slice %110 {offsets = [0, 32], sizes = [4, 32], strides = [1, 1]} : vector<4x64xf32> to vector<4x32xf32>
    %113 = arith.mulf %112, %99 : vector<4x32xf32>
    %cst_30 = arith.constant 1.000000e+00 : f32
    %114 = vector.broadcast %cst_30 : f32 to vector<4x32xf32>
    %115 = arith.subf %114, %112 : vector<4x32xf32>
    %116 = vector.extract_strided_slice %104 {offsets = [0, 64], sizes = [4, 32], strides = [1, 1]} : vector<4x128xf32> to vector<4x32xf32>
    %117 = vector.extract_strided_slice %104 {offsets = [0, 96], sizes = [4, 32], strides = [1, 1]} : vector<4x128xf32> to vector<4x32xf32>
    %118 = arith.mulf %111, %117 : vector<4x32xf32>
    %119 = arith.addf %116, %118 : vector<4x32xf32>
    %120 = math.tanh %119 : vector<4x32xf32>
    %121 = arith.mulf %115, %120 : vector<4x32xf32>
    %122 = arith.addf %121, %113 : vector<4x32xf32>
    %c4 = arith.constant 4 : index
    %c0_31 = arith.constant 0 : index
    %c0_32 = arith.constant 0 : index
    %123 = vector.load %arg3[%c4, %c0_31, %c0_32] : memref<8x4x32xf32, #tpu.memory_space<vmem>>, vector<1x4x32xf32>
    %124 = vector.shape_cast %123 : vector<1x4x32xf32> to vector<4x32xf32>
    %125 = vector.shape_cast %122 : vector<4x32xf32> to vector<1x4x32xf32>
    tpu.vector_store %arg3[%c4, %c0_31, %c0_32], %125 {strides = array<i32>} : memref<8x4x32xf32, #tpu.memory_space<vmem>>, vector<1x4x32xf32>,
    %cst_33 = arith.constant dense<0.000000e+00> : vector<4x128xf32>
    %126 = tpu.matmul %122, %8, %cst_33 {dimension_numbers = #tpu.dot_dimension_numbers<[1], [0], [0], [1], [0, 0, 1, 1], [], []>} : vector<4x32xf32>, vector<32x128xf32>, vector<4x128xf32> -> vector<4x128xf32>
    %127 = arith.addf %126, %3 : vector<4x128xf32>
    %128 = vector.extract_strided_slice %127 {offsets = [0, 0], sizes = [4, 64], strides = [1, 1]} : vector<4x128xf32> to vector<4x64xf32>
    %129 = arith.negf %128 : vector<4x64xf32>
    %130 = math.exp %129 : vector<4x64xf32>
    %cst_34 = arith.constant 1.000000e+00 : f32
    %131 = vector.broadcast %cst_34 : f32 to vector<4x64xf32>
    %132 = arith.addf %131, %130 : vector<4x64xf32>
    %133 = arith.divf %131, %132 : vector<4x64xf32>
    %134 = vector.extract_strided_slice %133 {offsets = [0, 0], sizes = [4, 32], strides = [1, 1]} : vector<4x64xf32> to vector<4x32xf32>
    %135 = vector.extract_strided_slice %133 {offsets = [0, 32], sizes = [4, 32], strides = [1, 1]} : vector<4x64xf32> to vector<4x32xf32>
    %136 = arith.mulf %135, %122 : vector<4x32xf32>
    %cst_35 = arith.constant 1.000000e+00 : f32
    %137 = vector.broadcast %cst_35 : f32 to vector<4x32xf32>
    %138 = arith.subf %137, %135 : vector<4x32xf32>
    %139 = vector.extract_strided_slice %127 {offsets = [0, 64], sizes = [4, 32], strides = [1, 1]} : vector<4x128xf32> to vector<4x32xf32>
    %140 = vector.extract_strided_slice %127 {offsets = [0, 96], sizes = [4, 32], strides = [1, 1]} : vector<4x128xf32> to vector<4x32xf32>
    %141 = arith.mulf %134, %140 : vector<4x32xf32>
    %142 = arith.addf %139, %141 : vector<4x32xf32>
    %143 = math.tanh %142 : vector<4x32xf32>
    %144 = arith.mulf %138, %143 : vector<4x32xf32>
    %145 = arith.addf %144, %136 : vector<4x32xf32>
    %c5 = arith.constant 5 : index
    %c0_36 = arith.constant 0 : index
    %c0_37 = arith.constant 0 : index
    %146 = vector.load %arg3[%c5, %c0_36, %c0_37] : memref<8x4x32xf32, #tpu.memory_space<vmem>>, vector<1x4x32xf32>
    %147 = vector.shape_cast %146 : vector<1x4x32xf32> to vector<4x32xf32>
    %148 = vector.shape_cast %145 : vector<4x32xf32> to vector<1x4x32xf32>
    tpu.vector_store %arg3[%c5, %c0_36, %c0_37], %148 {strides = array<i32>} : memref<8x4x32xf32, #tpu.memory_space<vmem>>, vector<1x4x32xf32>,
    %cst_38 = arith.constant dense<0.000000e+00> : vector<4x128xf32>
    %149 = tpu.matmul %145, %8, %cst_38 {dimension_numbers = #tpu.dot_dimension_numbers<[1], [0], [0], [1], [0, 0, 1, 1], [], []>} : vector<4x32xf32>, vector<32x128xf32>, vector<4x128xf32> -> vector<4x128xf32>
    %150 = arith.addf %149, %3 : vector<4x128xf32>
    %151 = vector.extract_strided_slice %150 {offsets = [0, 0], sizes = [4, 64], strides = [1, 1]} : vector<4x128xf32> to vector<4x64xf32>
    %152 = arith.negf %151 : vector<4x64xf32>
    %153 = math.exp %152 : vector<4x64xf32>
    %cst_39 = arith.constant 1.000000e+00 : f32
    %154 = vector.broadcast %cst_39 : f32 to vector<4x64xf32>
    %155 = arith.addf %154, %153 : vector<4x64xf32>
    %156 = arith.divf %154, %155 : vector<4x64xf32>
    %157 = vector.extract_strided_slice %156 {offsets = [0, 0], sizes = [4, 32], strides = [1, 1]} : vector<4x64xf32> to vector<4x32xf32>
    %158 = vector.extract_strided_slice %156 {offsets = [0, 32], sizes = [4, 32], strides = [1, 1]} : vector<4x64xf32> to vector<4x32xf32>
    %159 = arith.mulf %158, %145 : vector<4x32xf32>
    %cst_40 = arith.constant 1.000000e+00 : f32
    %160 = vector.broadcast %cst_40 : f32 to vector<4x32xf32>
    %161 = arith.subf %160, %158 : vector<4x32xf32>
    %162 = vector.extract_strided_slice %150 {offsets = [0, 64], sizes = [4, 32], strides = [1, 1]} : vector<4x128xf32> to vector<4x32xf32>
    %163 = vector.extract_strided_slice %150 {offsets = [0, 96], sizes = [4, 32], strides = [1, 1]} : vector<4x128xf32> to vector<4x32xf32>
    %164 = arith.mulf %157, %163 : vector<4x32xf32>
    %165 = arith.addf %162, %164 : vector<4x32xf32>
    %166 = math.tanh %165 : vector<4x32xf32>
    %167 = arith.mulf %161, %166 : vector<4x32xf32>
    %168 = arith.addf %167, %159 : vector<4x32xf32>
    %c6 = arith.constant 6 : index
    %c0_41 = arith.constant 0 : index
    %c0_42 = arith.constant 0 : index
    %169 = vector.load %arg3[%c6, %c0_41, %c0_42] : memref<8x4x32xf32, #tpu.memory_space<vmem>>, vector<1x4x32xf32>
    %170 = vector.shape_cast %169 : vector<1x4x32xf32> to vector<4x32xf32>
    %171 = vector.shape_cast %168 : vector<4x32xf32> to vector<1x4x32xf32>
    tpu.vector_store %arg3[%c6, %c0_41, %c0_42], %171 {strides = array<i32>} : memref<8x4x32xf32, #tpu.memory_space<vmem>>, vector<1x4x32xf32>,
    %cst_43 = arith.constant dense<0.000000e+00> : vector<4x128xf32>
    %172 = tpu.matmul %168, %8, %cst_43 {dimension_numbers = #tpu.dot_dimension_numbers<[1], [0], [0], [1], [0, 0, 1, 1], [], []>} : vector<4x32xf32>, vector<32x128xf32>, vector<4x128xf32> -> vector<4x128xf32>
    %173 = arith.addf %172, %3 : vector<4x128xf32>
    %174 = vector.extract_strided_slice %173 {offsets = [0, 0], sizes = [4, 64], strides = [1, 1]} : vector<4x128xf32> to vector<4x64xf32>
    %175 = arith.negf %174 : vector<4x64xf32>
    %176 = math.exp %175 : vector<4x64xf32>
    %cst_44 = arith.constant 1.000000e+00 : f32
    %177 = vector.broadcast %cst_44 : f32 to vector<4x64xf32>
    %178 = arith.addf %177, %176 : vector<4x64xf32>
    %179 = arith.divf %177, %178 : vector<4x64xf32>
    %180 = vector.extract_strided_slice %179 {offsets = [0, 0], sizes = [4, 32], strides = [1, 1]} : vector<4x64xf32> to vector<4x32xf32>
    %181 = vector.extract_strided_slice %179 {offsets = [0, 32], sizes = [4, 32], strides = [1, 1]} : vector<4x64xf32> to vector<4x32xf32>
    %182 = arith.mulf %181, %168 : vector<4x32xf32>
    %cst_45 = arith.constant 1.000000e+00 : f32
    %183 = vector.broadcast %cst_45 : f32 to vector<4x32xf32>
    %184 = arith.subf %183, %181 : vector<4x32xf32>
    %185 = vector.extract_strided_slice %173 {offsets = [0, 64], sizes = [4, 32], strides = [1, 1]} : vector<4x128xf32> to vector<4x32xf32>
    %186 = vector.extract_strided_slice %173 {offsets = [0, 96], sizes = [4, 32], strides = [1, 1]} : vector<4x128xf32> to vector<4x32xf32>
    %187 = arith.mulf %180, %186 : vector<4x32xf32>
    %188 = arith.addf %185, %187 : vector<4x32xf32>
    %189 = math.tanh %188 : vector<4x32xf32>
    %190 = arith.mulf %184, %189 : vector<4x32xf32>
    %191 = arith.addf %190, %182 : vector<4x32xf32>
    %c7 = arith.constant 7 : index
    %c0_46 = arith.constant 0 : index
    %c0_47 = arith.constant 0 : index
    %192 = vector.load %arg3[%c7, %c0_46, %c0_47] : memref<8x4x32xf32, #tpu.memory_space<vmem>>, vector<1x4x32xf32>
    %193 = vector.shape_cast %192 : vector<1x4x32xf32> to vector<4x32xf32>
    %194 = vector.shape_cast %191 : vector<4x32xf32> to vector<1x4x32xf32>
    tpu.vector_store %arg3[%c7, %c0_46, %c0_47], %194 {strides = array<i32>} : memref<8x4x32xf32, #tpu.memory_space<vmem>>, vector<1x4x32xf32>,
    return
  }
}

</mosaic_0001>

<bundles_post_ra>
// kernel: tpu_custom_call.1
= control target key start
LH: loop header
LB: loop body
LE: loop exit
PB: predicated region body
PF: predicated region fallthrough
CT: control target
= control target key end

     0   :  { %8 = vsyncpa [#allocation3], 0  ;;  %s1422_s0 = inlined_call_operand.hbm [shape: f32[1,4,32], index: 0, kind: input, shape index: {}]   ;;  %s1423_s1 = inlined_call_operand.hbm [shape: f32[1,64,128], index: 1, kind: input, shape index: {}]   ;;  %s1424_s2 = inlined_call_operand.vmem [shape: f32[1,1,128], index: 2, kind: input, shape index: {}]   ;;  %s1425_s3 = inlined_call_operand.hbm [shape: f32[8,4,32], index: 3, kind: output, shape index: {}]  }
   0x1   :  { %9 = vsyncpa [#allocation6], 0 }
   0x2   :  { %10 = vsyncpa [#allocation4], 0  ;;  %s1233_s12 = smov [#allocation2]   ;;  %s1234_s14 = smov [#allocation5]  }
   0x3   :  { %s17_s13 = sshll.u32 %s1233_s12, 4  ;;  %s26_s15 = sshll.u32 %s1234_s14, 4  ;;  %s18_s13 = int_to_ptr.vmem [resolvable:$true] %s17_s13  ;;  %s1265_s15 = int_to_ptr.vmem [resolvable:$true] %s26_s15 }
   0x4   :  { %s1161_s18 = scalar_lea.hbm %s1422_s0, 64 }
   0x5   :  { %p1162_p0 = scmp.ne.s32.totalorder %s1422_s0, %s1161_s18  ;;  %p1165_p1 = scmp.lt.u32.totalorder %s1161_s18, %s1422_s0 }
   0x7   :  { %p1167_p2 = pnand %p1165_p1, %p1162_p0 }
   0x9   :  { %1170 = shalt.err (!%p1167_p2)
}
   0xa   :  { %s1171_s23 = scalar_lea.vmem %s18_s13, 64  ;;  %p1176_p4 = scmp.lt.s32.totalorder %s18_s13, %s18_s13 }
   0xb   :  { %p1172_p3 = scmp.ne.s32.totalorder %s18_s13, %s1171_s23  ;;  %p1177_p5 = scmp.lt.s32.totalorder %s1171_s23, %s1171_s23 }
   0xd   :  { %p1178_p6 = por %p1177_p5, %p1176_p4 }
   0xf   :  { %p1179_p7 = pnand %p1178_p6, %p1172_p3 }
  0x11   :  { %1182 = shalt.err (!%p1179_p7)
}
  0x12   :  { %20 = dma.hbm_to_vmem [thread:$0]  %s1422_s0, 64, %s18_s13, [#allocation3]  }
  0x13   :  { %s1183_s28 = scalar_lea.hbm %s1423_s1, 1024 }
  0x14   :  { %p1184_p8 = scmp.ne.s32.totalorder %s1423_s1, %s1183_s28  ;;  %p1187_p9 = scmp.lt.u32.totalorder %s1183_s28, %s1423_s1 }
  0x16   :  { %p1189_p10 = pnand %p1187_p9, %p1184_p8 }
  0x18   :  { %1192 = shalt.err (!%p1189_p10)
}
  0x19   :  { %s1193_s6 = scalar_lea.vmem %s1265_s15, 1024  ;;  %p1198_p12 = scmp.lt.s32.totalorder %s1265_s15, %s1265_s15 }
  0x1a   :  { %p1194_p11 = scmp.ne.s32.totalorder %s1265_s15, %s1193_s6  ;;  %p1199_p13 = scmp.lt.s32.totalorder %s1193_s6, %s1193_s6 }
  0x1c   :  { %p1200_p0 = por %p1199_p13, %p1198_p12 }
  0x1e   :  { %p1201_p1 = pnand %p1200_p0, %p1194_p11 }
  0x20   :  { %1204 = shalt.err (!%p1201_p1)
}
  0x21   :  { %s1235_s0 = smov 128   ;;  %s1236_s7 = smov 8  }
  0x22   :  { %32 = dma.hbm_to_vmem [thread:$0]  %s1423_s1, 1024, %s1265_s15, [#allocation6], %s1235_s0, %s1235_s0, %s1236_s7  }
  0x23   :  { %1227 = dma.done.wait [#allocation3], 64  }
  0x24   :  { %1228 = vsyncadd [#allocation3], 4294967232 }
  0x25   :  { %1229 = dma.done.wait [#allocation6], 1024  }
  0x26   :  { %1230 = vsyncadd [#allocation6], 4294966272  ;;  %v1237_v0 = vmov 0.0|0.0   ;;  %vm1238_vm0 = vmmov 0   ;;  %v1239_v1 = vmov 0.0   ;;  %v48_v2 = vld [vmem:[#allocation5] sm:$0xff] }
  0x27   :  { %1053 = vmatprep.subr.bf16.mxu0 %v1237_v0  ;;  %973 = vmatprep.mubr.msk.f32.mxu0 %vm1238_vm0, %v1239_v1  ;;  %v49_v3 = vld [vmem:[#allocation5 + $0x8] sm:$0xff]  ;;  %v52_v4 = vld [vmem:[#allocation5 + $0x20] sm:$0xff]  ;;  %v50_v7 = vld [vmem:[#allocation5 + $0x10] sm:$0xff]  ;;  %s1240_s1 = smov 32   ;;  %vm61_vm1 = vcmask 261120   ;;  %s1241_s12 = smov 64  }
  0x28   :  { %1059 = vmatprep.subr.bf16.mxu1 %v1237_v0  ;;  %984 = vmatprep.mubr.msk.f32.mxu1 %vm1238_vm0, %v1239_v1  ;;  %v53_v5 = vld [vmem:[#allocation5 + $0x28] sm:$0xff]  ;;  %v56_v6 = vadd.f32 %v52_v4, %v48_v2  ;;  %v51_v8 = vld [vmem:[#allocation5 + $0x18] sm:$0xff]  ;;  %v54_v11 = vld [vmem:[#allocation5 + $0x30] sm:$0xff]  ;;  %vm167_vm2 = vcmask 257024   ;;  %s1243_s13 = smov [#allocation7]  }
  0x29   :  { %v57_v9 = vadd.f32 %v53_v5, %v49_v3  ;;  %v1054_v10 = vpack.c.bf16 %v53_v5, %v52_v4  ;;  %v55_v12 = vld [vmem:[#allocation5 + $0x38] sm:$0xff]  ;;  %v58_v14 = vadd.f32 %v54_v11, %v50_v7  ;;  %s895_s14 = sshll.u32 %s1243_s13, 4  ;;  %s896_s14 = int_to_ptr.vmem [resolvable:$true] %s895_s14 }
  0x2a   :  { %v60_v13 = vld [vmem:[#allocation2] sm:$0xf]  ;;  %v59_v15 = vadd.f32 %v55_v12, %v51_v8  ;;  %v1057_v17 = vpack.c.bf16 %v55_v12, %v54_v11  ;;  %s1205_s15 = scalar_lea.vmem %s896_s14, 512  ;;  %p1210_p3 = scmp.lt.s32.totalorder %s896_s14, %s896_s14 }
  0x2b   :  { %141 = vrot.lane.b32.xlu1 %v60_v13, %s1240_s1  ;;  %1055 = vmatpush3.bf16.msra.mxu0 %v1054_v10  ;;  %v1303_v16 = vpack.c.bf16 %v57_v9, %v56_v6  ;;  %v1323_v19 = vld [vmem:[%s1424_s2] ss:$0 sm:$0xff]  ;;  %s1242_s2 = smov 96   ;;  %p1206_p2 = scmp.ne.s32.totalorder %s896_s14, %s1205_s15 }
  0x2c   :  { %1056 = vmatprep.subr.bf16.mxu0 %v1237_v0  ;;  %v1306_v18 = vpack.c.bf16 %v59_v15, %v58_v14  ;;  %p1211_p4 = scmp.lt.s32.totalorder %s1205_s15, %s1205_s15 }
  0x2d   :  { %1061 = vmatpush3.bf16.msra.mxu1 %v1303_v16 }
  0x2e   :  { %1062 = vmatprep.subr.bf16.mxu1 %v1237_v0  ;;  %p1212_p5 = por %p1211_p4, %p1210_p3 }
  0x2f   :  { %1058 = vmatpush3.bf16.msra.mxu0 %v1057_v17 }
  0x30   :  { %1065 = vmatprep.subr.bf16.mxu0 %v1237_v0  ;;  %p1213_p6 = pnand %p1212_p5, %p1206_p2 }
  0x31   :  { %1064 = vmatpush3.bf16.msra.mxu1 %v1306_v18 }
  0x32   :  { %974 = vmatmul.mubr.msk.f32.vlgmr.msra.gmra.mrb[0].mxu0 %vm61_vm1, %v60_v13  ;;  %1071 = vmatprep.subr.bf16.mxu1 %v1237_v0 }
  0x33   :  { %1067 = vmatpush3.bf16.msra.mxu0 %v1303_v16  ;;  %995 = vmatprep.mubr.msk.f32.mxu0 %vm1238_vm0, %v1239_v1 }
  0x34   :  { %1068 = vmatprep.subr.bf16.mxu0 %v1237_v0 }
  0x37   :  { %1070 = vmatpush3.bf16.msra.mxu0 %v1306_v18 }
  0x38   :  { %1077 = vmatprep.subr.bf16.mxu0 %v1237_v0 }
  0x9d   :  { %v142_v32 = vpop.permute.xlu1 %141 }
 0x105   :  { %v131_v20 = vpop.f32.mrb[0].mxu0 }
 0x106   :  { %v132_v21 = vadd.f32 %v1323_v19, %v131_v20  ;;  %v975_v22 = vpop.f32.mrb[1].mxu0 }
 0x108   :  { %147 = vrot.lane.b32.xlu0 %v132_v21, %s1240_s1  ;;  %v910_v23 = vmul.f32 -1.442695, %v132_v21 }
 0x10a   :  { %1113 = vpow2.f32 %v910_v23 }
 0x114   :  { %v1114_v24 = vpop.eup %1113 }
 0x115   :  { %v138_v25 = vadd.f32 1.0, %v1114_v24 }
 0x117   :  { %1115 = vrcp.f32 %v138_v25 }
 0x121   :  { %v1116_v26 = vpop.eup %1115 }
 0x122   :  { %v145_v33 = vsub.f32 1.0, %v1116_v26  ;;  %v144_v35 = vmul.f32 %v1116_v26, %v142_v32 }
 0x17a   :  { %v148_v27 = vpop.permute.xlu0 %147 }
 0x17b   :  { %v150_v28 = vmul.f32 %v1116_v26, %v148_v27 }
 0x17d   :  { %152 = vrot.lane.b32.xlu0 %v150_v28, %s1241_s12 }
 0x1ef   :  { %v153_v29 = vpop.permute.xlu0 %152 }
 0x1f0   :  { %v155_v30 = vadd.f32 %v153_v29, %v132_v21 }
 0x1f2   :  { %1117 = vtanh.f32 %v155_v30 }
 0x1fc   :  { %v1118_v31 = vpop.eup %1117 }
 0x1fd   :  { %158 = vrot.lane.b32.xlu1 %v1118_v31, %s1242_s2 }
 0x26f   :  { %v159_v34 = vpop.permute.xlu1 %158 }
 0x270   :  { %v161_v36 = vmul.f32 %v159_v34, %v145_v33 }
 0x272   :  { %v162_v37 = vadd.f32 %v161_v36, %v144_v35 }
 0x274   :  { %164 = vrot.lane.b32.xlu0 %v162_v37, %s1242_s2 }
 0x2e6   :  { %v165_v38 = vpop.permute.xlu0 %164 }
 0x2e7   :  { %168 = vst.msk [vmem:[#allocation7] sm:$0xf] %vm167_vm2, %v165_v38  ;;  %985 = vmatmul.mubr.msk.f32.vlgmr.msra.gmra.mrb[0].mxu1 %vm61_vm1, %v165_v38 }
 0x2e8   :  { %1073 = vmatpush3.bf16.msra.mxu1 %v1303_v16  ;;  %1006 = vmatprep.mubr.msk.f32.mxu1 %vm1238_vm0, %v1239_v1 }
 0x2e9   :  { %1074 = vmatprep.subr.bf16.mxu1 %v1237_v0 }
 0x2ec   :  { %1076 = vmatpush3.bf16.msra.mxu1 %v1306_v18 }
 0x2ed   :  { %1083 = vmatprep.subr.bf16.mxu1 %v1237_v0 }
 0x3ba   :  { %v237_v39 = vpop.f32.mrb[0].mxu1 }
 0x3bb   :  { %v238_v40 = vadd.f32 %v1323_v19, %v237_v39  ;;  %v986_v41 = vpop.f32.mrb[1].mxu1 }
 0x3bd   :  { %250 = vrot.lane.b32.xlu1 %v238_v40, %s1240_s1  ;;  %v912_v42 = vmul.f32 -1.442695, %v238_v40 }
 0x3bf   :  { %1119 = vpow2.f32 %v912_v42 }
 0x3c9   :  { %v1120_v43 = vpop.eup %1119 }
 0x3ca   :  { %v244_v44 = vadd.f32 1.0, %v1120_v43 }
 0x3cc   :  { %1121 = vrcp.f32 %v244_v44 }
 0x3d6   :  { %v1122_v45 = vpop.eup %1121 }
 0x3d7   :  { %v248_v51 = vsub.f32 1.0, %v1122_v45  ;;  %v247_v53 = vmul.f32 %v1122_v45, %v162_v37 }
 0x42f   :  { %v251_v46 = vpop.permute.xlu1 %250 }
 0x430   :  { %v253_v47 = vmul.f32 %v1122_v45, %v251_v46 }
 0x432   :  { %255 = vrot.lane.b32.xlu0 %v253_v47, %s1241_s12 }
 0x4a4   :  { %v256_v48 = vpop.permute.xlu0 %255 }
 0x4a5   :  { %v258_v49 = vadd.f32 %v256_v48, %v238_v40 }
 0x4a7   :  { %1123 = vtanh.f32 %v258_v49 }
 0x4b1   :  { %v1124_v50 = vpop.eup %1123 }
 0x4b2   :  { %261 = vrot.lane.b32.xlu1 %v1124_v50, %s1242_s2 }
 0x524   :  { %v262_v52 = vpop.permute.xlu1 %261 }
 0x525   :  { %v264_v54 = vmul.f32 %v262_v52, %v248_v51 }
 0x527   :  { %v265_v55 = vadd.f32 %v264_v54, %v247_v53 }
 0x529   :  { %267 = vrot.lane.b32.xlu0 %v265_v55, %s1242_s2 }
 0x59b   :  { %v268_v56 = vpop.permute.xlu0 %267 }
 0x59c   :  { %271 = vst.msk [vmem:[#allocation7 + $0x4] sm:$0xf] %vm167_vm2, %v268_v56  ;;  %996 = vmatmul.mubr.msk.f32.vlgmr.msra.gmra.mrb[2].mxu0 %vm61_vm1, %v268_v56 }
 0x59d   :  { %1079 = vmatpush3.bf16.msra.mxu0 %v1303_v16  ;;  %1017 = vmatprep.mubr.msk.f32.mxu0 %vm1238_vm0, %v1239_v1 }
 0x59e   :  { %1080 = vmatprep.subr.bf16.mxu0 %v1237_v0 }
 0x5a1   :  { %1082 = vmatpush3.bf16.msra.mxu0 %v1306_v18 }
 0x5a2   :  { %1089 = vmatprep.subr.bf16.mxu0 %v1237_v0 }
 0x66f   :  { %v340_v57 = vpop.f32.mrb[2].mxu0 }
 0x670   :  { %v341_v58 = vadd.f32 %v1323_v19, %v340_v57  ;;  %v997_v59 = vpop.f32.mrb[3].mxu0 }
 0x672   :  { %353 = vrot.lane.b32.xlu1 %v341_v58, %s1240_s1  ;;  %v914_v60 = vmul.f32 -1.442695, %v341_v58 }
 0x674   :  { %1125 = vpow2.f32 %v914_v60 }
 0x67e   :  { %v1126_v61 = vpop.eup %1125 }
 0x67f   :  { %v347_v62 = vadd.f32 1.0, %v1126_v61 }
 0x681   :  { %1127 = vrcp.f32 %v347_v62 }
 0x68b   :  { %v1128_v63 = vpop.eup %1127 }
 0x68c   :  { %v351_v7 = vsub.f32 1.0, %v1128_v63  ;;  %v350_v9 = vmul.f32 %v1128_v63, %v265_v55 }
 0x6e4   :  { %v354_v2 = vpop.permute.xlu1 %353 }
 0x6e5   :  { %v356_v3 = vmul.f32 %v1128_v63, %v354_v2 }
 0x6e7   :  { %358 = vrot.lane.b32.xlu0 %v356_v3, %s1241_s12 }
 0x759   :  { %v359_v4 = vpop.permute.xlu0 %358 }
 0x75a   :  { %v361_v5 = vadd.f32 %v359_v4, %v341_v58 }
 0x75c   :  { %1129 = vtanh.f32 %v361_v5 }
 0x766   :  { %v1130_v6 = vpop.eup %1129 }
 0x767   :  { %364 = vrot.lane.b32.xlu1 %v1130_v6, %s1242_s2 }
 0x7d9   :  { %v365_v8 = vpop.permute.xlu1 %364 }
 0x7da   :  { %v367_v10 = vmul.f32 %v365_v8, %v351_v7 }
 0x7dc   :  { %v368_v11 = vadd.f32 %v367_v10, %v350_v9 }
 0x7de   :  { %370 = vrot.lane.b32.xlu0 %v368_v11, %s1242_s2 }
 0x850   :  { %v371_v12 = vpop.permute.xlu0 %370 }
 0x851   :  { %374 = vst.msk [vmem:[#allocation7 + $0x8] sm:$0xf] %vm167_vm2, %v371_v12  ;;  %1007 = vmatmul.mubr.msk.f32.vlgmr.msra.gmra.mrb[2].mxu1 %vm61_vm1, %v371_v12 }
 0x852   :  { %1085 = vmatpush3.bf16.msra.mxu1 %v1303_v16  ;;  %1028 = vmatprep.mubr.msk.f32.mxu1 %vm1238_vm0, %v1239_v1 }
 0x853   :  { %1086 = vmatprep.subr.bf16.mxu1 %v1237_v0 }
 0x856   :  { %1088 = vmatpush3.bf16.msra.mxu1 %v1306_v18 }
 0x857   :  { %1095 = vmatprep.subr.bf16.mxu1 %v1237_v0 }
 0x924   :  { %v443_v13 = vpop.f32.mrb[2].mxu1 }
 0x925   :  { %v444_v14 = vadd.f32 %v1323_v19, %v443_v13  ;;  %v1008_v15 = vpop.f32.mrb[3].mxu1 }
 0x927   :  { %456 = vrot.lane.b32.xlu1 %v444_v14, %s1240_s1  ;;  %v916_v17 = vmul.f32 -1.442695, %v444_v14 }
 0x929   :  { %1131 = vpow2.f32 %v916_v17 }
 0x933   :  { %v1132_v20 = vpop.eup %1131 }
 0x934   :  { %v450_v21 = vadd.f32 1.0, %v1132_v20 }
 0x936   :  { %1133 = vrcp.f32 %v450_v21 }
 0x940   :  { %v1134_v22 = vpop.eup %1133 }
 0x941   :  { %v454_v28 = vsub.f32 1.0, %v1134_v22  ;;  %v453_v30 = vmul.f32 %v1134_v22, %v368_v11 }
 0x999   :  { %v457_v23 = vpop.permute.xlu1 %456 }
 0x99a   :  { %v459_v24 = vmul.f32 %v1134_v22, %v457_v23 }
 0x99c   :  { %461 = vrot.lane.b32.xlu0 %v459_v24, %s1241_s12 }
 0xa0e   :  { %v462_v25 = vpop.permute.xlu0 %461 }
 0xa0f   :  { %v464_v26 = vadd.f32 %v462_v25, %v444_v14 }
 0xa11   :  { %1135 = vtanh.f32 %v464_v26 }
 0xa1b   :  { %v1136_v27 = vpop.eup %1135 }
 0xa1c   :  { %467 = vrot.lane.b32.xlu1 %v1136_v27, %s1242_s2 }
 0xa8e   :  { %v468_v29 = vpop.permute.xlu1 %467 }
 0xa8f   :  { %v470_v31 = vmul.f32 %v468_v29, %v454_v28 }
 0xa91   :  { %v471_v32 = vadd.f32 %v470_v31, %v453_v30 }
 0xa93   :  { %473 = vrot.lane.b32.xlu0 %v471_v32, %s1242_s2 }
 0xb05   :  { %v474_v33 = vpop.permute.xlu0 %473 }
 0xb06   :  { %477 = vst.msk [vmem:[#allocation7 + $0xc] sm:$0xf] %vm167_vm2, %v474_v33  ;;  %1018 = vmatmul.mubr.msk.f32.vlgmr.msra.gmra.mrb[4].mxu0 %vm61_vm1, %v474_v33 }
 0xb07   :  { %1091 = vmatpush3.bf16.msra.mxu0 %v1303_v16  ;;  %1039 = vmatprep.mubr.msk.f32.mxu0 %vm1238_vm0, %v1239_v1 }
 0xb08   :  { %1092 = vmatprep.subr.bf16.mxu0 %v1237_v0 }
 0xb0b   :  { %1094 = vmatpush3.bf16.msra.mxu0 %v1306_v18 }
 0xbd9   :  { %v546_v34 = vpop.f32.mrb[4].mxu0 }
 0xbda   :  { %v547_v35 = vadd.f32 %v1323_v19, %v546_v34  ;;  %v1019_v36 = vpop.f32.mrb[5].mxu0 }
 0xbdc   :  { %559 = vrot.lane.b32.xlu1 %v547_v35, %s1240_s1  ;;  %v918_v37 = vmul.f32 -1.442695, %v547_v35 }
 0xbde   :  { %1137 = vpow2.f32 %v918_v37 }
 0xbe8   :  { %v1138_v38 = vpop.eup %1137 }
 0xbe9   :  { %v553_v39 = vadd.f32 1.0, %v1138_v38 }
 0xbeb   :  { %1139 = vrcp.f32 %v553_v39 }
 0xbf5   :  { %v1140_v40 = vpop.eup %1139 }
 0xbf6   :  { %v557_v46 = vsub.f32 1.0, %v1140_v40  ;;  %v556_v48 = vmul.f32 %v1140_v40, %v471_v32 }
 0xc4e   :  { %v560_v41 = vpop.permute.xlu1 %559 }
 0xc4f   :  { %v562_v42 = vmul.f32 %v1140_v40, %v560_v41 }
 0xc51   :  { %564 = vrot.lane.b32.xlu0 %v562_v42, %s1241_s12 }
 0xcc3   :  { %v565_v43 = vpop.permute.xlu0 %564 }
 0xcc4   :  { %v567_v44 = vadd.f32 %v565_v43, %v547_v35 }
 0xcc6   :  { %1141 = vtanh.f32 %v567_v44 }
 0xcd0   :  { %v1142_v45 = vpop.eup %1141 }
 0xcd1   :  { %570 = vrot.lane.b32.xlu1 %v1142_v45, %s1242_s2 }
 0xd43   :  { %v571_v47 = vpop.permute.xlu1 %570 }
 0xd44   :  { %v573_v49 = vmul.f32 %v571_v47, %v557_v46 }
 0xd46   :  { %v574_v50 = vadd.f32 %v573_v49, %v556_v48 }
 0xd48   :  { %576 = vrot.lane.b32.xlu0 %v574_v50, %s1242_s2 }
 0xdba   :  { %v577_v51 = vpop.permute.xlu0 %576 }
 0xdbb   :  { %580 = vst.msk [vmem:[#allocation7 + $0x10] sm:$0xf] %vm167_vm2, %v577_v51  ;;  %1029 = vmatmul.mubr.msk.f32.vlgmr.msra.gmra.mrb[4].mxu1 %vm61_vm1, %v577_v51 }
 0xdbc   :  { %1097 = vmatpush3.bf16.msra.mxu1 %v1303_v16  ;;  %1050 = vmatprep.mubr.msk.f32.mxu1 %vm1238_vm0, %v1239_v1 }
 0xdbd   :  { %1098 = vmatprep.subr.bf16.mxu1 %v1237_v0 }
 0xdc0   :  { %1100 = vmatpush3.bf16.msra.mxu1 %v1306_v18 }
 0xe8e   :  { %v649_v52 = vpop.f32.mrb[4].mxu1 }
 0xe8f   :  { %v650_v53 = vadd.f32 %v1323_v19, %v649_v52  ;;  %v1030_v54 = vpop.f32.mrb[5].mxu1 }
 0xe91   :  { %662 = vrot.lane.b32.xlu1 %v650_v53, %s1240_s1  ;;  %v920_v55 = vmul.f32 -1.442695, %v650_v53 }
 0xe93   :  { %1143 = vpow2.f32 %v920_v55 }
 0xe9d   :  { %v1144_v56 = vpop.eup %1143 }
 0xe9e   :  { %v656_v57 = vadd.f32 1.0, %v1144_v56 }
 0xea0   :  { %1145 = vrcp.f32 %v656_v57 }
 0xeaa   :  { %v1146_v58 = vpop.eup %1145 }
 0xeab   :  { %v660_v60 = vsub.f32 1.0, %v1146_v58  ;;  %v659_v62 = vmul.f32 %v1146_v58, %v574_v50 }
 0xf03   :  { %v663_v16 = vpop.permute.xlu1 %662 }
 0xf04   :  { %v665_v59 = vmul.f32 %v1146_v58, %v663_v16 }
 0xf06   :  { %667 = vrot.lane.b32.xlu0 %v665_v59, %s1241_s12 }
 0xf78   :  { %v668_v1 = vpop.permute.xlu0 %667 }
 0xf79   :  { %v670_v0 = vadd.f32 %v668_v1, %v650_v53 }
 0xf7b   :  { %1147 = vtanh.f32 %v670_v0 }
 0xf85   :  { %v1148_v18 = vpop.eup %1147 }
 0xf86   :  { %673 = vrot.lane.b32.xlu1 %v1148_v18, %s1242_s2 }
 0xff8   :  { %v674_v61 = vpop.permute.xlu1 %673 }
 0xff9   :  { %v676_v63 = vmul.f32 %v674_v61, %v660_v60 }
 0xffb   :  { %v677_v2 = vadd.f32 %v676_v63, %v659_v62 }
 0xffd   :  { %679 = vrot.lane.b32.xlu0 %v677_v2, %s1242_s2 }
0x106f   :  { %v680_v3 = vpop.permute.xlu0 %679 }
0x1070   :  { %683 = vst.msk [vmem:[#allocation7 + $0x14] sm:$0xf] %vm167_vm2, %v680_v3  ;;  %1040 = vmatmul.mubr.msk.f32.vlgmr.msra.gmra.mrb[6].mxu0 %vm61_vm1, %v680_v3 }
0x1143   :  { %v752_v4 = vpop.f32.mrb[6].mxu0 }
0x1144   :  { %v753_v5 = vadd.f32 %v1323_v19, %v752_v4  ;;  %v1041_v6 = vpop.f32.mrb[7].mxu0 }
0x1146   :  { %765 = vrot.lane.b32.xlu1 %v753_v5, %s1240_s1  ;;  %v922_v7 = vmul.f32 -1.442695, %v753_v5 }
0x1148   :  { %1149 = vpow2.f32 %v922_v7 }
0x1152   :  { %v1150_v8 = vpop.eup %1149 }
0x1153   :  { %v759_v9 = vadd.f32 1.0, %v1150_v8 }
0x1155   :  { %1151 = vrcp.f32 %v759_v9 }
0x115f   :  { %v1152_v10 = vpop.eup %1151 }
0x1160   :  { %v763_v17 = vsub.f32 1.0, %v1152_v10  ;;  %v762_v21 = vmul.f32 %v1152_v10, %v677_v2 }
0x11b8   :  { %v766_v11 = vpop.permute.xlu1 %765 }
0x11b9   :  { %v768_v12 = vmul.f32 %v1152_v10, %v766_v11 }
0x11bb   :  { %770 = vrot.lane.b32.xlu0 %v768_v12, %s1241_s12 }
0x122d   :  { %v771_v13 = vpop.permute.xlu0 %770 }
0x122e   :  { %v773_v14 = vadd.f32 %v771_v13, %v753_v5 }
0x1230   :  { %1153 = vtanh.f32 %v773_v14 }
0x123a   :  { %v1154_v15 = vpop.eup %1153 }
0x123b   :  { %776 = vrot.lane.b32.xlu1 %v1154_v15, %s1242_s2 }
0x12ad   :  { %v777_v20 = vpop.permute.xlu1 %776 }
0x12ae   :  { %v779_v22 = vmul.f32 %v777_v20, %v763_v17 }
0x12b0   :  { %v780_v23 = vadd.f32 %v779_v22, %v762_v21 }
0x12b2   :  { %782 = vrot.lane.b32.xlu0 %v780_v23, %s1242_s2 }
0x1324   :  { %v783_v24 = vpop.permute.xlu0 %782 }
0x1325   :  { %786 = vst.msk [vmem:[#allocation7 + $0x18] sm:$0xf] %vm167_vm2, %v783_v24  ;;  %1051 = vmatmul.mubr.msk.f32.vlgmr.msra.gmra.mrb[6].mxu1 %vm61_vm1, %v783_v24 }
0x13f8   :  { %v855_v25 = vpop.f32.mrb[6].mxu1 }
0x13f9   :  { %v856_v26 = vadd.f32 %v1323_v19, %v855_v25  ;;  %v1052_v27 = vpop.f32.mrb[7].mxu1 }
0x13fb   :  { %868 = vrot.lane.b32.xlu1 %v856_v26, %s1240_s1  ;;  %v924_v28 = vmul.f32 -1.442695, %v856_v26 }
0x13fd   :  { %1155 = vpow2.f32 %v924_v28 }
0x1407   :  { %v1156_v29 = vpop.eup %1155 }
0x1408   :  { %v862_v30 = vadd.f32 1.0, %v1156_v29 }
0x140a   :  { %1157 = vrcp.f32 %v862_v30 }
0x1414   :  { %v1158_v31 = vpop.eup %1157 }
0x1415   :  { %v866_v19 = vsub.f32 1.0, %v1158_v31  ;;  %v865_v38 = vmul.f32 %v1158_v31, %v780_v23 }
0x146d   :  { %v869_v32 = vpop.permute.xlu1 %868 }
0x146e   :  { %v871_v33 = vmul.f32 %v1158_v31, %v869_v32 }
0x1470   :  { %873 = vrot.lane.b32.xlu0 %v871_v33, %s1241_s12 }
0x14e2   :  { %v874_v34 = vpop.permute.xlu0 %873 }
0x14e3   :  { %v876_v35 = vadd.f32 %v874_v34, %v856_v26 }
0x14e5   :  { %1159 = vtanh.f32 %v876_v35 }
0x14ef   :  { %v1160_v36 = vpop.eup %1159 }
0x14f0   :  { %879 = vrot.lane.b32.xlu1 %v1160_v36, %s1242_s2 }
0x1562   :  { %v880_v37 = vpop.permute.xlu1 %879 }
0x1563   :  { %v882_v39 = vmul.f32 %v880_v37, %v866_v19 }
0x1565   :  { %v883_v40 = vadd.f32 %v882_v39, %v865_v38 }
0x1567   :  { %885 = vrot.lane.b32.xlu0 %v883_v40, %s1242_s2 }
0x15d9   :  { %v886_v41 = vpop.permute.xlu0 %885 }
0x15da   :  { %889 = vst.msk [vmem:[#allocation7 + $0x1c] sm:$0xf] %vm167_vm2, %v886_v41 }
0x15db   :  { %1216 = shalt.err (!%p1213_p6)
}
0x15dc   :  { %s1217_s18 = scalar_lea.hbm %s1425_s3, 512 }
0x15dd   :  { %p1218_p7 = scmp.ne.s32.totalorder %s1425_s3, %s1217_s18  ;;  %p1221_p8 = scmp.lt.u32.totalorder %s1217_s18, %s1425_s3 }
0x15df   :  { %p1223_p9 = pnand %p1221_p8, %p1218_p7 }
0x15e1   :  { %1226 = shalt.err (!%p1223_p9)
}
0x15e2   :  { %s1244_s23 = smov 4  }
0x15e3   :  { %901 = dma.vmem_to_hbm [thread:$0]  %s896_s14, 512, %s1425_s3, [#allocation4], %s1241_s12, %s1241_s12, %s1244_s23  }
0x15e4   :  { %1231 = dma.done.wait [#allocation4], 512  }
0x15e5   :  { %1232 = vsyncadd [#allocation4], 4294966784 }
0x15e6   :  { %905 = vsyncpa [#allocation3], 1 }
0x15e7   :  { %906 = vsyncpa [#allocation6], 1 }
0x15e8   :  { %907 = vsyncpa [#allocation4], 1 }

</bundles_post_ra>
